<compile_context>
chip_gen: v7x
topology: tpu7x:2x2x1
jax: 0.10.0
libtpu: 0.0.40
codegen_flags: <defaults>
</compile_context>

<pallas_src>
import functools
import math

import jax
import jax.numpy as jnp
from jax.experimental import pallas as pl
from jax.experimental.pallas import tpu as pltpu

_LOG_CLIP_MIN = math.log(1e-9)   # log of the torch.clamp lower bound on p


def _combo_kernel(x_ref, lab_ref, out_ref,
                  acc_inter, acc_pred, acc_lab, acc_ce, *,
                  alpha, valid_pixels, need_mask, rows_per_block):
    """One grid step = one (batch n, pixel-row tile r) slab, all C channels.

    x_ref:   (1, C, TR, 128)  logits (any float dtype; upcast to f32 here)
    lab_ref: (1, TR, 128)     int32 class ids
    out_ref: (1, 4, 128)      f32 per-batch lane partials
                              [intersection, pred_sum, label_sum, ce_sum]
    acc_*:   (TR, 128)        f32 VMEM partial-sum accumulators
    """
    r = pl.program_id(1)

    @pl.when(r == 0)
    def _():
        acc_inter[...] = jnp.zeros_like(acc_inter)
        acc_pred[...] = jnp.zeros_like(acc_pred)
        acc_lab[...] = jnp.zeros_like(acc_lab)
        acc_ce[...] = jnp.zeros_like(acc_ce)

    x = x_ref[0].astype(jnp.float32)             # (C, TR, 128)
    lab = lab_ref[0]                             # (TR, 128) int32

    # Per-pixel softmax over the (leading) channel axis, in log space.
    m = jnp.max(x, axis=0, keepdims=True)        # (1, TR, 128)
    z = x - m
    e = jnp.exp(z)                               # EUP, once per element
    se = jnp.sum(e, axis=0, keepdims=True)       # VPU adds across channels
    inv_se = pl.reciprocal(se, approx=False)     # one reciprocal per pixel
    lse = jnp.log(se)                            # one log per pixel
    p = e * inv_se                               # softmax probabilities

    # torch.clamp(one_hot, 1e-4, 1.0): 1.0 on the true class, 1e-4 elsewhere.
    cls = jax.lax.broadcasted_iota(jnp.int32, p.shape, 0)
    t = jnp.where(cls == lab[None], jnp.float32(1.0), jnp.float32(1e-4))

    # log(clip(p, 1e-9, 1-1e-9)) computed directly from the logits.
    logp = jnp.clip(z - lse, _LOG_CLIP_MIN, 0.0)
    log1mp = jnp.log(jnp.maximum(1.0 - p, 1e-9))
    ce = -(alpha * (t * logp + (1.0 - alpha) * (1.0 - t) * log1mp))

    inter_c = jnp.sum(p * t, axis=0)             # (TR, 128)
    pred_c = jnp.sum(p, axis=0)
    lab_c = jnp.sum(t, axis=0)
    ce_c = jnp.sum(ce, axis=0)

    if need_mask:                                # static: only when padded
        rows = jax.lax.broadcasted_iota(jnp.int32, (rows_per_block, 128), 0)
        lanes = jax.lax.broadcasted_iota(jnp.int32, (rows_per_block, 128), 1)
        pix = (r * rows_per_block + rows) * 128 + lanes
        maskf = (pix < valid_pixels).astype(jnp.float32)
        inter_c = inter_c * maskf
        pred_c = pred_c * maskf
        lab_c = lab_c * maskf
        ce_c = ce_c * maskf

    acc_inter[...] += inter_c
    acc_pred[...] += pred_c
    acc_lab[...] += lab_c
    acc_ce[...] += ce_c

    @pl.when(r == pl.num_programs(1) - 1)
    def _():
        # Sublane-reduce only; the final cross-lane reduce and the dice /
        # weighted-CE / combo math run on the tiny (N, 4, 128) partials in
        # the JAX wrapper (keeps the reduction associative across
        # megacore-split batch indices).
        out_ref[0, 0:1, :] = jnp.sum(acc_inter[...], axis=0, keepdims=True)
        out_ref[0, 1:2, :] = jnp.sum(acc_pred[...], axis=0, keepdims=True)
        out_ref[0, 2:3, :] = jnp.sum(acc_lab[...], axis=0, keepdims=True)
        out_ref[0, 3:4, :] = jnp.sum(acc_ce[...], axis=0, keepdims=True)


def _derive_vmem_limit_bytes():
    """Chip-derived VMEM limit with ~25% headroom (v7x has only 64 MiB/TC)."""
    try:
        cap = int(pltpu.get_tpu_info().vmem_capacity_bytes)
    except Exception:
        cap = 64 * 1024 * 1024            # conservative (v7x per-core size)
    return max(32 * 1024 * 1024, min(cap * 3 // 4, 96 * 1024 * 1024))


def _choose_row_tile(R, sub, x_row_bytes, x_block_cap, per_row_bytes,
                     total_cap):
    """Largest TR (multiple of `sub`, dividing R) whose logits block stays
    under x_block_cap and whose estimated total VMEM footprint stays under
    total_cap.  R is always a multiple of `sub`, so TR=sub is a valid
    fallback."""
    best = sub
    tr = sub
    while tr <= R:
        if (R % tr == 0 and x_row_bytes * tr <= x_block_cap
                and per_row_bytes * tr <= total_cap):
            best = tr
        tr += sub
    return best


def combo_loss(pred, labels, *, num_class, alpha, ce_ratio,
               x_block_cap_bytes=4 * 1024 * 1024):
    """JAX/Pallas equivalent of ComboLoss.forward.

    pred:   (N, C, H, W) raw logits (f32 or bf16; math is f32 in-kernel)
    labels: (N, H, W) or (N, 1, H, W) integer class ids in [0, num_class)
    returns dict {'weighted_ce', 'dice', 'total'}
    """
    N, C, H, W = pred.shape
    assert C == num_class, "predict & num_class do not match"

    if labels.ndim == 4:                  # accept (N, 1, H, W) too
        labels = labels[:, 0]
    labels = labels.astype(jnp.int32)
    # NOTE: labels could be shipped as int8 (needs TR % 32 == 0 tiling) to
    # shave ~15-20% HBM traffic at small C; kept int32 for lowering
    # robustness.
    if not jnp.issubdtype(pred.dtype, jnp.floating):
        pred = pred.astype(jnp.float32)

    x_itemsize = jnp.dtype(pred.dtype).itemsize
    # sublane granularity for the logits dtype (f32: 8, bf16: 16, int8: 32)
    sub = {4: 8, 2: 16, 1: 32}.get(x_itemsize, 8)

    P = H * W
    pad_unit = sub * 128
    P_pad = ((P + pad_unit - 1) // pad_unit) * pad_unit
    R = P_pad // 128                      # lane-dense pixel rows

    pred_flat = pred.reshape(N, C, P)     # free: NCHW is contiguous
    lab_flat = labels.reshape(N, P)
    if P_pad != P:                        # pad + in-kernel mask (rare path)
        pred_flat = jnp.pad(pred_flat, ((0, 0), (0, 0), (0, P_pad - P)))
        lab_flat = jnp.pad(lab_flat, ((0, 0), (0, P_pad - P)))
    pred_rows = pred_flat.reshape(N, C, R, 128)
    lab_rows = lab_flat.reshape(N, R, 128)

    # Tile the pixel rows so that double-buffered inputs + 4 accumulators +
    # ~8 live (C, TR, 128) f32 temporaries fit comfortably in VMEM.
    vmem_limit = _derive_vmem_limit_bytes()
    x_row_bytes = C * 128 * x_itemsize
    per_row_bytes = (2 * x_row_bytes          # double-buffered logits
                     + 2 * 128 * 4            # double-buffered labels (i32)
                     + 4 * 128 * 4            # 4 f32 accumulators
                     + 8 * C * 128 * 4)       # ~8 live f32 temporaries
    TR = _choose_row_tile(R, sub, x_row_bytes, x_block_cap_bytes,
                          per_row_bytes, int(vmem_limit * 0.7))
    n_r = R // TR
    total_elems = N * C * H * W

    kernel = functools.partial(
        _combo_kernel, alpha=float(alpha), valid_pixels=P,
        need_mask=(P_pad != P), rows_per_block=TR)

    elems = N * C * P_pad
    cost = pl.CostEstimate(
        flops=18 * elems,
        transcendentals=2 * elems + N * P_pad,
        bytes_accessed=elems * x_itemsize + N * P_pad * 4 + N * 4 * 128 * 4,
    )

    # NOTE: if the per-step DMA is still exposed after enlarging tiles,
    # pipeline_mode=pl.Buffered(3) on the logits spec is a cheap sweep.
    partials = pl.pallas_call(
        kernel,
        out_shape=jax.ShapeDtypeStruct((N, 4, 128), jnp.float32),
        grid_spec=pltpu.PrefetchScalarGridSpec(
            num_scalar_prefetch=0,
            grid=(N, n_r),
            in_specs=[
                pl.BlockSpec((1, C, TR, 128), lambda n, r: (n, 0, r, 0)),
                pl.BlockSpec((1, TR, 128), lambda n, r: (n, r, 0)),
            ],
            out_specs=pl.BlockSpec((1, 4, 128), lambda n, r: (n, 0, 0)),
            scratch_shapes=[pltpu.VMEM((TR, 128), jnp.float32)] * 4,
        ),
        compiler_params=pltpu.CompilerParams(
            dimension_semantics=("parallel", "arbitrary"),
            vmem_limit_bytes=vmem_limit,
        ),
        cost_estimate=cost,
    )(pred_rows, lab_rows)

    sums = jnp.sum(partials, axis=(0, 2))          # (4,)
    intersection, pred_sum, label_sum, ce_sum = (
        sums[0], sums[1], sums[2], sums[3])
    dice = (2.0 * intersection + 1e-6) / (pred_sum + label_sum + 1e-6)
    weighted_ce = ce_sum / jnp.float32(total_elems)
    combo = ce_ratio * weighted_ce + (1.0 - ce_ratio) * dice
    return {"weighted_ce": weighted_ce, "dice": dice, "total": combo}


def _combo_loss_ref(pred, labels, num_class, alpha, ce_ratio):
    """Pure-jnp reference mirroring the PyTorch ComboLoss code."""
    p = jax.nn.softmax(pred.astype(jnp.float32), axis=1)
    one_hot = jax.nn.one_hot(labels, num_class, dtype=jnp.float32)  # (N,H,W,C)
    one_hot = jnp.transpose(one_hot, (0, 3, 1, 2))                  # (N,C,H,W)
    one_hot = jnp.clip(one_hot, 0.0001, 1.0)

    intersection = jnp.sum(p * one_hot)
    dice = (2.0 * intersection + 1e-6) / (jnp.sum(p) + jnp.sum(one_hot) + 1e-6)

    pc = jnp.clip(p, 1e-9, 1.0 - 1e-9)
    out = -(alpha * (one_hot * jnp.log(pc)
                     + (1.0 - alpha) * (1.0 - one_hot) * jnp.log(1.0 - pc)))
    weighted_ce = jnp.mean(out)
    combo = ce_ratio * weighted_ce + (1.0 - ce_ratio) * dice
    return {"weighted_ce": weighted_ce, "dice": dice, "total": combo}


if __name__ == "__main__":
    N, C, H, W = 2, 4, 16, 16
    ALPHA, CE_RATIO = 0.5, 0.5

    key = jax.random.PRNGKey(0)
    k_in, k_lab = jax.random.split(key)
    pred = jax.random.normal(k_in, (N, C, H, W), dtype=jnp.float32)
    labels = jax.random.randint(k_lab, (N, H, W), 0, C, dtype=jnp.int32)

    out = combo_loss(pred, labels, num_class=C, alpha=ALPHA, ce_ratio=CE_RATIO)
    jax.block_until_ready(out["total"])

    ref = _combo_loss_ref(pred, labels, C, ALPHA, CE_RATIO)
    for k in ("weighted_ce", "dice", "total"):
        assert jnp.allclose(out[k], ref[k], rtol=1e-5, atol=1e-5), (
            k, out[k], ref[k])

    print("KERNEL_OK")
</pallas_src>

<mosaic_0001>
module attributes {stable_mosaic.version = 11 : i64} {
  func.func @_combo_kernel(%arg0: i32, %arg1: i32, %arg2: memref<1x4x8x128xf32, #tpu.memory_space<vmem>>, %arg3: memref<1x8x128xi32, #tpu.memory_space<vmem>>, %arg4: memref<1x4x128xf32, #tpu.memory_space<vmem>>, %arg5: memref<8x128xf32, #tpu.memory_space<vmem>>, %arg6: memref<8x128xf32, #tpu.memory_space<vmem>>, %arg7: memref<8x128xf32, #tpu.memory_space<vmem>>, %arg8: memref<8x128xf32, #tpu.memory_space<vmem>>) attributes {dimension_semantics = [#tpu.dimension_semantics<parallel>, #tpu.dimension_semantics<arbitrary>], iteration_bounds = array<i64: 2, 1>, scalar_prefetch = 0 : i64, scratch_operands = 4 : i64, tpu.core_type = #tpu.core_type<tc>, window_params = [{transform_indices = @transform_0, window_bounds = array<i64: 1, 4, 8, 128>}, {transform_indices = @transform_1, window_bounds = array<i64: 1, 8, 128>}, {transform_indices = @transform_2, window_bounds = array<i64: 1, 4, 128>}]} {
    %c0_i32 = arith.constant 0 : i32
    %0 = arith.cmpi eq, %arg1, %c0_i32 : i32
    %1 = arith.extui %0 : i1 to i32
    %c0_i32_0 = arith.constant 0 : i32
    %2 = arith.cmpi ne, %1, %c0_i32_0 : i32
    scf.if %2 {
      %cst_40 = arith.constant 0.000000e+00 : f32
      %83 = vector.broadcast %cst_40 : f32 to vector<8x128xf32>
      %c0_41 = arith.constant 0 : index
      %c0_42 = arith.constant 0 : index
      %84 = vector.load %arg5[%c0_41, %c0_42] : memref<8x128xf32, #tpu.memory_space<vmem>>, vector<8x128xf32>
      tpu.vector_store %arg5[%c0_41, %c0_42], %83 {strides = array<i32>} : memref<8x128xf32, #tpu.memory_space<vmem>>, vector<8x128xf32>,
      %cst_43 = arith.constant 0.000000e+00 : f32
      %85 = vector.broadcast %cst_43 : f32 to vector<8x128xf32>
      %c0_44 = arith.constant 0 : index
      %c0_45 = arith.constant 0 : index
      %86 = vector.load %arg6[%c0_44, %c0_45] : memref<8x128xf32, #tpu.memory_space<vmem>>, vector<8x128xf32>
      tpu.vector_store %arg6[%c0_44, %c0_45], %85 {strides = array<i32>} : memref<8x128xf32, #tpu.memory_space<vmem>>, vector<8x128xf32>,
      %cst_46 = arith.constant 0.000000e+00 : f32
      %87 = vector.broadcast %cst_46 : f32 to vector<8x128xf32>
      %c0_47 = arith.constant 0 : index
      %c0_48 = arith.constant 0 : index
      %88 = vector.load %arg7[%c0_47, %c0_48] : memref<8x128xf32, #tpu.memory_space<vmem>>, vector<8x128xf32>
      tpu.vector_store %arg7[%c0_47, %c0_48], %87 {strides = array<i32>} : memref<8x128xf32, #tpu.memory_space<vmem>>, vector<8x128xf32>,
      %cst_49 = arith.constant 0.000000e+00 : f32
      %89 = vector.broadcast %cst_49 : f32 to vector<8x128xf32>
      %c0_50 = arith.constant 0 : index
      %c0_51 = arith.constant 0 : index
      %90 = vector.load %arg8[%c0_50, %c0_51] : memref<8x128xf32, #tpu.memory_space<vmem>>, vector<8x128xf32>
      tpu.vector_store %arg8[%c0_50, %c0_51], %89 {strides = array<i32>} : memref<8x128xf32, #tpu.memory_space<vmem>>, vector<8x128xf32>,
    } else {
    }
    %c0 = arith.constant 0 : index
    %c0_1 = arith.constant 0 : index
    %c0_2 = arith.constant 0 : index
    %c0_3 = arith.constant 0 : index
    %3 = vector.load %arg2[%c0, %c0_1, %c0_2, %c0_3] : memref<1x4x8x128xf32, #tpu.memory_space<vmem>>, vector<1x4x8x128xf32>
    %4 = vector.shape_cast %3 : vector<1x4x8x128xf32> to vector<4x8x128xf32>
    %c0_4 = arith.constant 0 : index
    %c0_5 = arith.constant 0 : index
    %c0_6 = arith.constant 0 : index
    %5 = vector.load %arg3[%c0_4, %c0_5, %c0_6] : memref<1x8x128xi32, #tpu.memory_space<vmem>>, vector<1x8x128xi32>
    %6 = vector.shape_cast %5 : vector<1x8x128xi32> to vector<8x128xi32>
    %cst = arith.constant dense<0xFF800000> : vector<8x128xf32>
    %7 = vector.multi_reduction <maximumf>, %4, %cst [0] : vector<4x8x128xf32> to vector<8x128xf32>
    %8 = vector.shape_cast %7 : vector<8x128xf32> to vector<1x8x128xf32>
    %9 = vector.broadcast %8 : vector<1x8x128xf32> to vector<4x8x128xf32>
    %10 = arith.subf %4, %9 : vector<4x8x128xf32>
    %11 = math.exp %10 : vector<4x8x128xf32>
    %cst_7 = arith.constant dense<0.000000e+00> : vector<8x128xf32>
    %12 = vector.multi_reduction <add>, %11, %cst_7 [0] : vector<4x8x128xf32> to vector<8x128xf32>
    %13 = vector.shape_cast %12 : vector<8x128xf32> to vector<1x8x128xf32>
    %14 = tpu.reciprocal %13 : vector<1x8x128xf32> -> vector<1x8x128xf32>
    %15 = math.log %13 : vector<1x8x128xf32>
    %16 = vector.broadcast %14 : vector<1x8x128xf32> to vector<4x8x128xf32>
    %17 = arith.mulf %11, %16 : vector<4x8x128xf32>
    %18 = tpu.iota {dimensions = array<i32: 0>} : vector<4x8x128xi32>
    %19 = vector.shape_cast %6 : vector<8x128xi32> to vector<1x8x128xi32>
    %20 = vector.broadcast %19 : vector<1x8x128xi32> to vector<4x8x128xi32>
    %21 = arith.cmpi eq, %18, %20 : vector<4x8x128xi32>
    %cst_8 = arith.constant 1.000000e+00 : f32
    %cst_9 = arith.constant 9.99999974E-5 : f32
    %22 = vector.broadcast %cst_8 : f32 to vector<4x8x128xf32>
    %23 = vector.broadcast %cst_9 : f32 to vector<4x8x128xf32>
    %24 = arith.select %21, %22, %23 : vector<4x8x128xi1>, vector<4x8x128xf32>
    %25 = vector.broadcast %15 : vector<1x8x128xf32> to vector<4x8x128xf32>
    %26 = arith.subf %10, %25 : vector<4x8x128xf32>
    %cst_10 = arith.constant -20.7232666 : f32
    %cst_11 = arith.constant 0.000000e+00 : f32
    %27 = vector.broadcast %cst_10 : f32 to vector<4x8x128xf32>
    %28 = arith.maximumf %27, %26 : vector<4x8x128xf32>
    %29 = vector.broadcast %cst_11 : f32 to vector<4x8x128xf32>
    %30 = arith.minimumf %29, %28 : vector<4x8x128xf32>
    %cst_12 = arith.constant 1.000000e+00 : f32
    %31 = vector.broadcast %cst_12 : f32 to vector<4x8x128xf32>
    %32 = arith.subf %31, %17 : vector<4x8x128xf32>
    %cst_13 = arith.constant 9.99999971E-10 : f32
    %33 = vector.broadcast %cst_13 : f32 to vector<4x8x128xf32>
    %34 = arith.maximumf %32, %33 : vector<4x8x128xf32>
    %35 = math.log %34 : vector<4x8x128xf32>
    %36 = arith.mulf %24, %30 : vector<4x8x128xf32>
    %cst_14 = arith.constant 1.000000e+00 : f32
    %37 = vector.broadcast %cst_14 : f32 to vector<4x8x128xf32>
    %38 = arith.subf %37, %24 : vector<4x8x128xf32>
    %cst_15 = arith.constant 5.000000e-01 : f32
    %39 = vector.broadcast %cst_15 : f32 to vector<4x8x128xf32>
    %40 = arith.mulf %39, %38 : vector<4x8x128xf32>
    %41 = arith.mulf %40, %35 : vector<4x8x128xf32>
    %42 = arith.addf %36, %41 : vector<4x8x128xf32>
    %cst_16 = arith.constant 5.000000e-01 : f32
    %43 = vector.broadcast %cst_16 : f32 to vector<4x8x128xf32>
    %44 = arith.mulf %43, %42 : vector<4x8x128xf32>
    %cst_17 = arith.constant 0.000000e+00 : f32
    %45 = vector.broadcast %cst_17 : f32 to vector<4x8x128xf32>
    %46 = arith.subf %45, %44 : vector<4x8x128xf32>
    %47 = arith.mulf %17, %24 : vector<4x8x128xf32>
    %cst_18 = arith.constant dense<0.000000e+00> : vector<8x128xf32>
    %48 = vector.multi_reduction <add>, %47, %cst_18 [0] : vector<4x8x128xf32> to vector<8x128xf32>
    %cst_19 = arith.constant dense<0.000000e+00> : vector<8x128xf32>
    %49 = vector.multi_reduction <add>, %17, %cst_19 [0] : vector<4x8x128xf32> to vector<8x128xf32>
    %cst_20 = arith.constant dense<0.000000e+00> : vector<8x128xf32>
    %50 = vector.multi_reduction <add>, %24, %cst_20 [0] : vector<4x8x128xf32> to vector<8x128xf32>
    %cst_21 = arith.constant dense<0.000000e+00> : vector<8x128xf32>
    %51 = vector.multi_reduction <add>, %46, %cst_21 [0] : vector<4x8x128xf32> to vector<8x128xf32>
    %52 = tpu.iota {dimensions = array<i32: 0>} : vector<8x128xi32>
    %53 = tpu.iota {dimensions = array<i32: 1>} : vector<8x128xi32>
    %c8_i32 = arith.constant 8 : i32
    %54 = arith.muli %arg1, %c8_i32 : i32
    %55 = vector.broadcast %54 : i32 to vector<8x128xi32>
    %56 = arith.addi %55, %52 : vector<8x128xi32>
    %c128_i32 = arith.constant 128 : i32
    %57 = vector.broadcast %c128_i32 : i32 to vector<8x128xi32>
    %58 = arith.muli %56, %57 : vector<8x128xi32>
    %59 = arith.addi %58, %53 : vector<8x128xi32>
    %c256_i32 = arith.constant 256 : i32
    %60 = vector.broadcast %c256_i32 : i32 to vector<8x128xi32>
    %61 = arith.cmpi slt, %59, %60 : vector<8x128xi32>
    %62 = arith.extui %61 : vector<8x128xi1> to vector<8x128xi32>
    %63 = arith.sitofp %62 : vector<8x128xi32> to vector<8x128xf32>
    %64 = arith.mulf %48, %63 : vector<8x128xf32>
    %65 = arith.mulf %49, %63 : vector<8x128xf32>
    %66 = arith.mulf %50, %63 : vector<8x128xf32>
    %67 = arith.mulf %51, %63 : vector<8x128xf32>
    %c0_22 = arith.constant 0 : index
    %c0_23 = arith.constant 0 : index
    %68 = vector.load %arg5[%c0_22, %c0_23] : memref<8x128xf32, #tpu.memory_space<vmem>>, vector<8x128xf32>
    %69 = arith.addf %68, %64 : vector<8x128xf32>
    %c0_24 = arith.constant 0 : index
    %c0_25 = arith.constant 0 : index
    %70 = vector.load %arg5[%c0_24, %c0_25] : memref<8x128xf32, #tpu.memory_space<vmem>>, vector<8x128xf32>
    tpu.vector_store %arg5[%c0_24, %c0_25], %69 {strides = array<i32>} : memref<8x128xf32, #tpu.memory_space<vmem>>, vector<8x128xf32>,
    %c0_26 = arith.constant 0 : index
    %c0_27 = arith.constant 0 : index
    %71 = vector.load %arg6[%c0_26, %c0_27] : memref<8x128xf32, #tpu.memory_space<vmem>>, vector<8x128xf32>
    %72 = arith.addf %71, %65 : vector<8x128xf32>
    %c0_28 = arith.constant 0 : index
    %c0_29 = arith.constant 0 : index
    %73 = vector.load %arg6[%c0_28, %c0_29] : memref<8x128xf32, #tpu.memory_space<vmem>>, vector<8x128xf32>
    tpu.vector_store %arg6[%c0_28, %c0_29], %72 {strides = array<i32>} : memref<8x128xf32, #tpu.memory_space<vmem>>, vector<8x128xf32>,
    %c0_30 = arith.constant 0 : index
    %c0_31 = arith.constant 0 : index
    %74 = vector.load %arg7[%c0_30, %c0_31] : memref<8x128xf32, #tpu.memory_space<vmem>>, vector<8x128xf32>
    %75 = arith.addf %74, %66 : vector<8x128xf32>
    %c0_32 = arith.constant 0 : index
    %c0_33 = arith.constant 0 : index
    %76 = vector.load %arg7[%c0_32, %c0_33] : memref<8x128xf32, #tpu.memory_space<vmem>>, vector<8x128xf32>
    tpu.vector_store %arg7[%c0_32, %c0_33], %75 {strides = array<i32>} : memref<8x128xf32, #tpu.memory_space<vmem>>, vector<8x128xf32>,
    %c0_34 = arith.constant 0 : index
    %c0_35 = arith.constant 0 : index
    %77 = vector.load %arg8[%c0_34, %c0_35] : memref<8x128xf32, #tpu.memory_space<vmem>>, vector<8x128xf32>
    %78 = arith.addf %77, %67 : vector<8x128xf32>
    %c0_36 = arith.constant 0 : index
    %c0_37 = arith.constant 0 : index
    %79 = vector.load %arg8[%c0_36, %c0_37] : memref<8x128xf32, #tpu.memory_space<vmem>>, vector<8x128xf32>
    tpu.vector_store %arg8[%c0_36, %c0_37], %78 {strides = array<i32>} : memref<8x128xf32, #tpu.memory_space<vmem>>, vector<8x128xf32>,
    %c0_i32_38 = arith.constant 0 : i32
    %80 = arith.cmpi eq, %arg1, %c0_i32_38 : i32
    %81 = arith.extui %80 : i1 to i32
    %c0_i32_39 = arith.constant 0 : i32
    %82 = arith.cmpi ne, %81, %c0_i32_39 : i32
    scf.if %82 {
      %c0_40 = arith.constant 0 : index
      %c0_41 = arith.constant 0 : index
      %83 = vector.load %arg5[%c0_40, %c0_41] : memref<8x128xf32, #tpu.memory_space<vmem>>, vector<8x128xf32>
      %cst_42 = arith.constant dense<0.000000e+00> : vector<128xf32>
      %84 = vector.multi_reduction <add>, %83, %cst_42 [0] : vector<8x128xf32> to vector<128xf32>
      %85 = vector.shape_cast %84 : vector<128xf32> to vector<1x128xf32>
      %c0_43 = arith.constant 0 : index
      %c0_44 = arith.constant 0 : index
      %c0_45 = arith.constant 0 : index
      %86 = vector.load %arg4[%c0_43, %c0_44, %c0_45] : memref<1x4x128xf32, #tpu.memory_space<vmem>>, vector<1x1x128xf32>
      %87 = vector.shape_cast %86 : vector<1x1x128xf32> to vector<1x128xf32>
      %88 = vector.shape_cast %85 : vector<1x128xf32> to vector<1x1x128xf32>
      tpu.vector_store %arg4[%c0_43, %c0_44, %c0_45], %88 {strides = array<i32>} : memref<1x4x128xf32, #tpu.memory_space<vmem>>, vector<1x1x128xf32>,
      %c0_46 = arith.constant 0 : index
      %c0_47 = arith.constant 0 : index
      %89 = vector.load %arg6[%c0_46, %c0_47] : memref<8x128xf32, #tpu.memory_space<vmem>>, vector<8x128xf32>
      %cst_48 = arith.constant dense<0.000000e+00> : vector<128xf32>
      %90 = vector.multi_reduction <add>, %89, %cst_48 [0] : vector<8x128xf32> to vector<128xf32>
      %91 = vector.shape_cast %90 : vector<128xf32> to vector<1x128xf32>
      %c0_49 = arith.constant 0 : index
      %c1 = arith.constant 1 : index
      %c0_50 = arith.constant 0 : index
      %92 = vector.load %arg4[%c0_49, %c1, %c0_50] : memref<1x4x128xf32, #tpu.memory_space<vmem>>, vector<1x1x128xf32>
      %93 = vector.shape_cast %92 : vector<1x1x128xf32> to vector<1x128xf32>
      %94 = vector.shape_cast %91 : vector<1x128xf32> to vector<1x1x128xf32>
      tpu.vector_store %arg4[%c0_49, %c1, %c0_50], %94 {strides = array<i32>} : memref<1x4x128xf32, #tpu.memory_space<vmem>>, vector<1x1x128xf32>,
      %c0_51 = arith.constant 0 : index
      %c0_52 = arith.constant 0 : index
      %95 = vector.load %arg7[%c0_51, %c0_52] : memref<8x128xf32, #tpu.memory_space<vmem>>, vector<8x128xf32>
      %cst_53 = arith.constant dense<0.000000e+00> : vector<128xf32>
      %96 = vector.multi_reduction <add>, %95, %cst_53 [0] : vector<8x128xf32> to vector<128xf32>
      %97 = vector.shape_cast %96 : vector<128xf32> to vector<1x128xf32>
      %c0_54 = arith.constant 0 : index
      %c2 = arith.constant 2 : index
      %c0_55 = arith.constant 0 : index
      %98 = vector.load %arg4[%c0_54, %c2, %c0_55] : memref<1x4x128xf32, #tpu.memory_space<vmem>>, vector<1x1x128xf32>
      %99 = vector.shape_cast %98 : vector<1x1x128xf32> to vector<1x128xf32>
      %100 = vector.shape_cast %97 : vector<1x128xf32> to vector<1x1x128xf32>
      tpu.vector_store %arg4[%c0_54, %c2, %c0_55], %100 {strides = array<i32>} : memref<1x4x128xf32, #tpu.memory_space<vmem>>, vector<1x1x128xf32>,
      %c0_56 = arith.constant 0 : index
      %c0_57 = arith.constant 0 : index
      %101 = vector.load %arg8[%c0_56, %c0_57] : memref<8x128xf32, #tpu.memory_space<vmem>>, vector<8x128xf32>
      %cst_58 = arith.constant dense<0.000000e+00> : vector<128xf32>
      %102 = vector.multi_reduction <add>, %101, %cst_58 [0] : vector<8x128xf32> to vector<128xf32>
      %103 = vector.shape_cast %102 : vector<128xf32> to vector<1x128xf32>
      %c0_59 = arith.constant 0 : index
      %c3 = arith.constant 3 : index
      %c0_60 = arith.constant 0 : index
      %104 = vector.load %arg4[%c0_59, %c3, %c0_60] : memref<1x4x128xf32, #tpu.memory_space<vmem>>, vector<1x1x128xf32>
      %105 = vector.shape_cast %104 : vector<1x1x128xf32> to vector<1x128xf32>
      %106 = vector.shape_cast %103 : vector<1x128xf32> to vector<1x1x128xf32>
      tpu.vector_store %arg4[%c0_59, %c3, %c0_60], %106 {strides = array<i32>} : memref<1x4x128xf32, #tpu.memory_space<vmem>>, vector<1x1x128xf32>,
    } else {
    }
    return
  }
  func.func @transform_0(%arg0: i32, %arg1: i32) -> (i32, i32, i32, i32) {
    %c0_i32 = arith.constant 0 : i32
    %c0_i32_0 = arith.constant 0 : i32
    %c0_i32_1 = arith.constant 0 : i32
    return %arg0, %c0_i32, %arg1, %c0_i32_0 : i32, i32, i32, i32
  }
  func.func @transform_1(%arg0: i32, %arg1: i32) -> (i32, i32, i32) {
    %c0_i32 = arith.constant 0 : i32
    %c0_i32_0 = arith.constant 0 : i32
    return %arg0, %arg1, %c0_i32 : i32, i32, i32
  }
  func.func @transform_2(%arg0: i32, %arg1: i32) -> (i32, i32, i32) {
    %c0_i32 = arith.constant 0 : i32
    %c0_i32_0 = arith.constant 0 : i32
    %c0_i32_1 = arith.constant 0 : i32
    return %arg0, %c0_i32, %c0_i32_0 : i32, i32, i32
  }
}

</mosaic_0001>

<bundles_post_ra>
// kernel: tpu_custom_call.1
= control target key start
LH: loop header
LB: loop body
LE: loop exit
PB: predicated region body
PF: predicated region fallthrough
CT: control target
= control target key end

     0   :  { %7 = vsyncpa [#allocation7], 0  ;;  %s1065_s0 = inlined_call_operand.hbm [shape: f32[2,4,8,128], index: 0, kind: input, shape index: {}]   ;;  %s1066_s1 = inlined_call_operand.hbm [shape: s32[2,8,128], index: 1, kind: input, shape index: {}]   ;;  %s1067_s2 = inlined_call_operand.hbm [shape: f32[2,4,128], index: 2, kind: output, shape index: {}]  }
   0x1   :  { %9 = vsyncpa [#allocation7 + $0x1], 0 }
   0x2   :  { %10 = vsyncpa [#allocation10], 0 }
   0x3   :  { %12 = vsyncpa [#allocation10 + $0x1], 0 }
   0x4   :  { %13 = vsyncpa [#allocation8], 0 }
   0x5   :  { %15 = vsyncpa [#allocation8 + $0x1], 0  ;;  %s796_s9 = smov 0   ;;  %s798_s10 = smov 0  }
   0x6   :  { %s800_s11 = smov 0   ;;  %s802_s12 = smov 0  }
   0x7   :  { %s804_s13 = smov 0   ;;  %s806_s14 = smov 0  }
   0x8 LB: > { %s516_s15 = sadd.s32 4294967295, %s772_s14   ;;  %s517_s16 = sadd.s32 4294967294, %s772_s14   ;;  %s772_s14 = sphi %s806_s14, %s21_s14   ;;  %s768_s13 = sphi %s804_s13, %s1086_s13   ;;  %s764_s12 = sphi %s802_s12, %s1085_s12   ;;  %s760_s11 = sphi %s800_s11, %s1084_s11   ;;  %s756_s10 = sphi %s798_s10, %s1083_s10   ;;  %s752_s9 = sphi %s796_s9, %s1082_s9  }
   0x9   : > { %s33_s17 = sadd.s32 1, %s768_s13  ;;  %s42_s18 = sadd.s32 1, %s760_s11 }
   0xa   : > { %p35_p0 = scmp.ge.s32.totalorder %s33_s17, 2  ;;  %p49_p1 = scmp.ne.s32.totalorder %s760_s11, %s756_s10 }
   0xb   : > { %p50_p2 = scmp.eq.s32.totalorder %s772_s14, 0  ;;  %p55_p3 = scmp.ne.s32.totalorder %s756_s10, %s752_s9 }
   0xc   : > { %s1088_s17 = smov (%p35_p0, %s33_s17), 0  ;;  %p56_p5 = scmp.eq.s32.totalorder %s516_s15, 0 }
   0xd   : > { %p837_p4 = por %p50_p2, %p49_p1  ;;  %s37_s20 = ssub.s32 %s768_s13, %s1088_s17 }
   0xe   : > { %p107_p6 = scmp.eq.s32.totalorder %s516_s15, 1  ;;  %p40_p7 = scmp.eq.s32.totalorder %s37_s20, 0 }
   0xf   : > { %p843_p8 = por %p56_p5, %p55_p3  ;;  %p113_p10 = scmp.eq.s32.totalorder %s517_s16, 1 }
  0x10   : > { %p847_p9 = por %p107_p6, %p49_p1  ;;  %p552_p13 = scmp.lt.s32.totalorder %s772_s14, 2 }
  0x11   : > { %s1071_s21 = scalar_select %p843_p8, 1, 0 }
  0x12   : > { %s1072_s22 = scalar_select %p847_p9, 1, 0 }
  0x13   : > { %s852_s23 = scalar_select %p40_p7, %s760_s11, %s42_s18  }
  0x14   : > { %p854_p11 = por %p113_p10, %p55_p3  ;;  %s861_s25 = sand.u32 1, %s760_s11  }
  0x15   : > { %s520_s26 = sshll.u32 %s861_s25, 5  ;;  %s534_s27 = sshll.u32 %s768_s13, 9 }
  0x16   : > { %s1073_s24 = scalar_select %p854_p11, 1, 0 }
  0x17   : > { %s868_s30 = scalar_lea.hbm %s1065_s0, %s534_s27  ;;  %s137_s3 = scalar_lea.vmem [#allocation6], %s520_s26 }
  0x18   : > { %s145_s4 = sshll.u32 %s137_s3, 4  ;;  %p874_p0 = pnand %p552_p13, %p837_p4  ;;  %s870_s4 = int_to_ptr.vmem [resolvable:$true] %s145_s4 }
  0x19   : > { %s134_s6 = scalar_lea.sflag [#allocation7], %s861_s25  ;;  %s626_s7 = scalar_lea.hbm %s868_s30, 512 }
  0x1a   : > { %p627_p2 = scmp.ne.s32.totalorder %s868_s30, %s626_s7  ;;  %p628_p3 = pneg %p874_p0 }
  0x1b   : > { %s631_s16 = scalar_lea.hbm %s1065_s0, 1024  ;;  %p632_p4 = scmp.lt.u32.totalorder %s868_s30, %s1065_s0 }
  0x1c   : > { %p629_p5 = pnand %p628_p3, %p627_p2  ;;  %p633_p7 = scmp.lt.u32.totalorder %s631_s16, %s626_s7 }
  0x1d   : > { %p635_p13 = scmp.lt.u32.totalorder %s626_s7, %s868_s30 }
  0x1e   : > { %p630_p6 = pneg %p629_p5  ;;  %p634_p10 = por %p633_p7, %p632_p4 }
  0x20   : > { %p636_p12 = por %p635_p13, %p634_p10 }
  0x22   : > { %p637_p1 = pnand %p636_p12, %p630_p6 }
  0x24   : > { %640 = shalt.err (!%p637_p1)
}
  0x25   : > { %s641_s20 = scalar_lea.vmem %s870_s4, 512  ;;  %s774_s26 = smov [#allocation6]  }
  0x26   : > { %p642_p2 = scmp.ne.s32.totalorder %s870_s4, %s641_s20  ;;  %s646_s27 = sshll.u32 %s774_s26, 4  ;;  %s647_s27 = int_to_ptr.vmem [resolvable:$false] %s646_s27 }
  0x27   : > { %s648_s28 = scalar_lea.vmem %s647_s27, 1024  ;;  %p649_p9 = scmp.lt.s32.totalorder %s870_s4, %s647_s27 }
  0x28   : > { %p644_p5 = pnand %p642_p2, %p628_p3  ;;  %p650_p4 = scmp.lt.s32.totalorder %s648_s28, %s641_s20 }
  0x2a   : > { %p645_p11 = pneg %p644_p5  ;;  %p651_p7 = por %p650_p4, %p649_p9 }
  0x2c   : > { %p652_p10 = pnand %p651_p7, %p645_p11 }
  0x2e   : > { %655 = shalt.err (!%p652_p10)
}
  0x2f   : > { %s775_s29 = smov 128   ;;  %s776_s3 = smov 8  }
  0x30   : > { %544 = dma.hbm_to_vmem [thread:$0]  (!%p874_p0), %s868_s30, 512, %s870_s4, %s134_s6, %s775_s29, %s775_s29, %s776_s3  }
  0x31   : > { %p172_p12 = scmp.lt.s32.totalorder %s772_s14, 3  ;;  %s523_s7 = sshll.u32 %s861_s25, 3 }
  0x32   : > { %s524_s8 = sshll.u32 %s768_s13, 7  ;;  %p1075_p9 = scmp.ge.s32.totalorder %s772_s14, 1 }
  0x33   : > { %s919_s19 = scalar_lea.hbm %s1066_s1, %s524_s8  ;;  %s159_s20 = scalar_lea.vmem [#allocation9], %s523_s7 }
  0x34   : > { %p912_p11 = pnand %p1075_p9, %p172_p12  ;;  %s167_s26 = sshll.u32 %s159_s20, 4  ;;  %s168_s26 = int_to_ptr.vmem [resolvable:$true] %s167_s26 }
  0x35   : > { %s156_s30 = scalar_lea.sflag [#allocation10], %s861_s25  ;;  %s656_s4 = scalar_lea.hbm %s919_s19, 128 }
  0x36   : > { %s1076_s15 = scalar_select %p912_p11, 1, 0 }
  0x37   : > { %p657_p1 = scmp.ne.s32.totalorder %s919_s19, %s656_s4  ;;  %s661_s28 = scalar_lea.hbm %s1066_s1, 256 }
  0x38   : > { %p662_p2 = scmp.lt.u32.totalorder %s919_s19, %s1066_s1  ;;  %p663_p5 = scmp.lt.u32.totalorder %s661_s28, %s656_s4 }
  0x39   : > { %p659_p6 = pnand %p657_p1, %p628_p3  ;;  %p665_p7 = scmp.lt.u32.totalorder %s656_s4, %s919_s19 }
  0x3a   : > { %p664_p4 = por %p663_p5, %p662_p2 }
  0x3b   : > { %p660_p13 = pneg %p659_p6 }
  0x3c   : > { %p666_p10 = por %p665_p7, %p664_p4 }
  0x3e   : > { %p667_p12 = pnand %p666_p10, %p660_p13 }
  0x40   : > { %670 = shalt.err (!%p667_p12)
}
  0x41   : > { %s671_s25 = scalar_lea.vmem %s168_s26, 128  ;;  %s777_s7 = smov [#allocation9]  }
  0x42   : > { %p672_p9 = scmp.ne.s32.totalorder %s168_s26, %s671_s25  ;;  %s676_s8 = sshll.u32 %s777_s7, 4  ;;  %s677_s8 = int_to_ptr.vmem [resolvable:$false] %s676_s8 }
  0x43   : > { %s678_s16 = scalar_lea.vmem %s677_s8, 256  ;;  %p679_p8 = scmp.lt.s32.totalorder %s168_s26, %s677_s8 }
  0x44   : > { %p674_p1 = pnand %p672_p9, %p628_p3  ;;  %p680_p11 = scmp.lt.s32.totalorder %s678_s16, %s671_s25 }
  0x46   : > { %p675_p6 = pneg %p674_p1  ;;  %p681_p2 = por %p680_p11, %p679_p8 }
  0x48   : > { %p682_p5 = pnand %p681_p2, %p675_p6 }
  0x4a   : > { %685 = shalt.err (!%p682_p5)
}
  0x4b   : > { %547 = dma.hbm_to_vmem [thread:$0]  (!%p874_p0), %s919_s19, 128, %s168_s26, %s156_s30  }
  0x4c   : > { %p1077_p13 = scmp.ne.s32.totalorder %s1076_s15, 0 }
  0x4d   : > { %s944_s18 = sand.u32 (!%p1077_p13), 1, %s756_s10   ;;  %p1078_p3 = scmp.ne.s32.totalorder (!%p1077_p13), %s1071_s21, 0 }
  0x4e   : > { %176 = sbr.rel (%p1077_p13) target bundleno = 191 (0xbf), region = 28  ;;  %s526_s20 = sshll.u32 (!%p1077_p13), %s944_s18, 5 }
  0x4f   : > { %s179_s4 = scalar_lea.sflag (!%p1077_p13), [#allocation7], %s944_s18  ;;  %s182_s6 = scalar_lea.vmem (!%p1077_p13), [#allocation6], %s526_s20 }
  0x55   : > { %739 = dma.done.wait (%p1078_p3), %s179_s4, 512  }
  0x56   : > { %741 = vsyncadd (%p1078_p3), %s179_s4, 4294966784  ;;  %s527_s5 = sshll.u32 %s944_s18, 3  ;;  %s188_s15 = scalar_lea.sflag [#allocation10], %s944_s18 }
  0x57   : > { %s191_s19 = scalar_lea.vmem [#allocation9], %s527_s5 }
  0x58   : > { %743 = dma.done.wait (%p1078_p3), %s188_s15, 128  }
  0x59   : > { %745 = vsyncadd (%p1078_p3), %s188_s15, 4294967168  ;;  %v335_v0 = vlaneseq  ;;  %v225_v4 = vld [vmem:[%s182_s6] sm:$0xff]  ;;  %v226_v5 = vld [vmem:[%s182_s6 + $0x8] sm:$0xff]  ;;  %v778_v12 = vmov 0.0001   ;;  %v779_v23 = vmov 0.0  }
  0x5a   : > { %v227_v6 = vld [vmem:[%s182_s6 + $0x10] sm:$0xff]  ;;  %v228_v8 = vld [vmem:[%s182_s6 + $0x18] sm:$0xff]  ;;  %v229_v9 = vld [vmem:[%s191_s19] sm:$0xff]  ;;  %v230_v10 = vmax.f32 %v225_v4, %v226_v5  ;;  %s528_s21 = sshll.u32 %s944_s18, 2  ;;  %s531_s27 = sshll.u32 %s764_s12, 6 }
  0x5b   : > { %v336_v1 = vshrl.u32 %v335_v0, 7  ;;  %v338_v2 = vand.u32 127, %v335_v0  ;;  %v231_v11 = vmax.f32 %v227_v6, %v228_v8  ;;  %vm255_vm0 = vcmp.eq.s32.totalorder %v229_v9, 0  ;;  %s986_s26 = scalar_lea.vmem [#allocation11], %s528_s21  ;;  %s1017_s3 = scalar_lea.hbm %s1067_s2, %s531_s27 }
  0x5c   : > { %vm256_vm1 = vcmp.eq.s32.totalorder %v229_v9, 1  ;;  %vm257_vm2 = vcmp.eq.s32.totalorder %v229_v9, 2  ;;  %v958_v13 = vsel %vm255_vm0, 1.0, %v778_v12  ;;  %vm258_vm3 = vcmp.eq.s32.totalorder %v229_v9, 3  ;;  %s412_s30 = sshll.u32 %s986_s26, 4  ;;  %s399_s25 = scalar_lea.sflag [#allocation8], %s944_s18  ;;  %s1012_s30 = int_to_ptr.vmem [resolvable:$true] %s412_s30 }
  0x5d   : > { %v342_v3 = vmul.u32 128, %v336_v1  ;;  %v960_v14 = vsel %vm256_vm1, 1.0, %v778_v12  ;;  %v232_v15 = vmax.f32 %v230_v10, %v231_v11  ;;  %v964_v17 = vsel %vm257_vm2, 1.0, %v778_v12  ;;  %s686_s7 = scalar_lea.vmem %s1012_s30, 64  ;;  %p1079_p0 = scmp.ne.s32.totalorder %s1072_s22, 0 }
  0x5e   : > { %v329_v16 = vadd.f32 %v960_v14, %v958_v13  ;;  %v974_v22 = vsel %vm258_vm3, 1.0, %v778_v12  ;;  %p687_p8 = scmp.ne.s32.totalorder %s1012_s30, %s686_s7  ;;  %s780_s12 = smov [#allocation11]  }
  0x5f   : > { %v343_v7 = vadd.s32 %v342_v3, %v338_v2  ;;  %v966_v18 = vsub.f32 %v225_v4, %v232_v15  ;;  %v968_v19 = vsub.f32 %v226_v5, %v232_v15  ;;  %v970_v20 = vsub.f32 %v227_v6, %v232_v15  ;;  %s690_s8 = sshll.u32 %s780_s12, 4  ;;  %s691_s8 = int_to_ptr.vmem [resolvable:$false] %s690_s8 }
  0x60   : > { %v972_v21 = vsub.f32 %v228_v8, %v232_v15  ;;  %v330_v25 = vadd.f32 %v329_v16, %v964_v17  ;;  %p688_p11 = pnand %p687_p8, %p1079_p0  ;;  %s692_s16 = scalar_lea.vmem %s691_s8, 128 }
  0x61   : > { %vm344_vm4 = vcmp.lt.s32.totalorder %v343_v7, 256  ;;  %v237_v26 = vmul.f32 1.442695, %v966_v18  ;;  %v239_v27 = vmul.f32 1.442695, %v968_v19  ;;  %p693_p7 = scmp.lt.s32.totalorder %s1012_s30, %s691_s8  ;;  %p694_p10 = scmp.lt.s32.totalorder %s692_s16, %s686_s7 }
  0x62   : > { %v976_v24 = vsel %vm344_vm4, 1.0, %v779_v23  ;;  %v241_v28 = vmul.f32 1.442695, %v970_v20  ;;  %v243_v29 = vmul.f32 1.442695, %v972_v21  ;;  %v331_v30 = vadd.f32 %v330_v25, %v974_v22  ;;  %p689_p4 = pneg %p688_p11 }
  0x63   : > { %606 = vpow2.f32 %v237_v26  ;;  %p695_p12 = por %p694_p10, %p693_p7 }
  0x64   : > { %608 = vpow2.f32 %v239_v27  ;;  %v349_v31 = vmul.f32 %v976_v24, %v331_v30  ;;  %v296_v30 = vsub.f32 1.0, %v960_v14 }
  0x65   : > { %610 = vpow2.f32 %v241_v28  ;;  %v295_v28 = vsub.f32 1.0, %v958_v13  ;;  %p696_p9 = pnand %p695_p12, %p689_p4 }
  0x66   : > { %612 = vpow2.f32 %v243_v29  ;;  %v383_v32 = vrot.slane %v349_v31, 4 }
  0x68   : > { %v384_v33 = vadd.f32 %v383_v32, %v349_v31  ;;  %v297_v32 = vsub.f32 1.0, %v964_v17 }
  0x6a   : > { %v385_v34 = vrot.slane %v384_v33, 2 }
  0x6c   : > { %v386_v35 = vadd.f32 %v385_v34, %v384_v33  ;;  %v298_v34 = vsub.f32 1.0, %v974_v22 }
  0x6d   : > { %v607_v36 = vpop.eup %606 }
  0x6e   : > { %v609_v37 = vpop.eup %608  ;;  %v387_v38 = vrot.slane %v386_v35, 1 }
  0x6f   : > { %v611_v39 = vpop.eup %610  ;;  %v245_v40 = vadd.f32 %v609_v37, %v607_v36 }
  0x70   : > { %v613_v41 = vpop.eup %612  ;;  %v388_v42 = vadd.f32 %v387_v38, %v386_v35 }
  0x71   : > { %v246_v43 = vadd.f32 %v611_v39, %v245_v40 }
  0x72   : > { %389 = vst [vmem:[%s986_s26 + $0x2] sm:$0x1] %v388_v42 }
  0x73   : > { %v247_v44 = vadd.f32 %v613_v41, %v246_v43 }
  0x75   : > { %614 = vrcp.f32 %v247_v44 }
  0x76   : > { %616 = vlog2.f32 %v247_v44 }
  0x7f   : > { %v615_v45 = vpop.eup %614 }
  0x80   : > { %v251_v46 = vmul.f32 %v615_v45, %v607_v36  ;;  %v252_v47 = vmul.f32 %v615_v45, %v609_v37  ;;  %v253_v48 = vmul.f32 %v615_v45, %v611_v39  ;;  %v617_v49 = vpop.eup %616  ;;  %v254_v50 = vmul.f32 %v615_v45, %v613_v41 }
  0x81   : > { %v250_v60 = vmul.f32 0.6931472, %v617_v49  ;;  %v299_v37 = vmul.f32 0.5, %v295_v28  ;;  %v300_v41 = vmul.f32 0.5, %v296_v30 }
  0x82   : > { %v319_v51 = vmul.f32 %v958_v13, %v251_v46  ;;  %v320_v52 = vmul.f32 %v960_v14, %v252_v47  ;;  %v321_v53 = vmul.f32 %v964_v17, %v253_v48  ;;  %v326_v54 = vadd.f32 %v252_v47, %v251_v46 }
  0x83   : > { %v322_v55 = vmul.f32 %v974_v22, %v254_v50  ;;  %v275_v57 = vsub.f32 1.0, %v251_v46  ;;  %v276_v58 = vsub.f32 1.0, %v252_v47  ;;  %v277_v62 = vsub.f32 1.0, %v253_v48 }
  0x84   : > { %v323_v56 = vadd.f32 %v320_v52, %v319_v51  ;;  %v327_v59 = vadd.f32 %v326_v54, %v253_v48  ;;  %v278_v63 = vsub.f32 1.0, %v254_v50  ;;  %v263_v5 = vsub.f32 %v966_v18, %v250_v60 }
  0x85   : > { %v279_v2 = vmax.f32 %v275_v57, 1e-09  ;;  %v280_v3 = vmax.f32 %v276_v58, 1e-09  ;;  %v281_v6 = vmax.f32 %v277_v62, 1e-09  ;;  %v264_v9 = vsub.f32 %v968_v19, %v250_v60 }
  0x86   : > { %v324_v61 = vadd.f32 %v323_v56, %v321_v53  ;;  %v328_v0 = vadd.f32 %v327_v59, %v254_v50  ;;  %v282_v7 = vmax.f32 %v278_v63, 1e-09  ;;  %v265_v11 = vsub.f32 %v970_v20, %v250_v60 }
  0x87   : > { %618 = vlog2.f32 %v279_v2  ;;  %v266_v15 = vsub.f32 %v972_v21, %v250_v60  ;;  %v267_v23 = vmax.f32 %v263_v5, -20.723267  ;;  %v268_v18 = vmax.f32 %v264_v9, -20.723267 }
  0x88   : > { %v325_v1 = vadd.f32 %v324_v61, %v322_v55  ;;  %v348_v4 = vmul.f32 %v976_v24, %v328_v0  ;;  %620 = vlog2.f32 %v280_v3  ;;  %v269_v27 = vmax.f32 %v265_v11, -20.723267 }
  0x89   : > { %622 = vlog2.f32 %v281_v6  ;;  %v270_v19 = vmax.f32 %v266_v15, -20.723267  ;;  %v271_v20 = vmin.f32 %v267_v23, 0.0  ;;  %v272_v21 = vmin.f32 %v268_v18, 0.0 }
  0x8a   : > { %v347_v8 = vmul.f32 %v976_v24, %v325_v1  ;;  %v375_v10 = vrot.slane %v348_v4, 4  ;;  %624 = vlog2.f32 %v282_v7  ;;  %v273_v36 = vmin.f32 %v269_v27, 0.0 }
  0x8b   : > { %v274_v40 = vmin.f32 %v270_v19, 0.0  ;;  %v291_v45 = vmul.f32 %v271_v20, %v958_v13  ;;  %v301_v46 = vmul.f32 0.5, %v297_v32  ;;  %v292_v50 = vmul.f32 %v272_v21, %v960_v14 }
  0x8c   : > { %v367_v12 = vrot.slane %v347_v8, 4  ;;  %v376_v16 = vadd.f32 %v375_v10, %v348_v4  ;;  %v302_v51 = vmul.f32 0.5, %v298_v34  ;;  %v293_v54 = vmul.f32 %v273_v36, %v964_v17 }
  0x8d   : > { %v294_v57 = vmul.f32 %v274_v40, %v974_v22 }
  0x8e   : > { %v368_v25 = vadd.f32 %v367_v12, %v347_v8  ;;  %v377_v26 = vrot.slane %v376_v16, 2 }
  0x90   : > { %v369_v29 = vrot.slane %v368_v25, 2  ;;  %v378_v31 = vadd.f32 %v377_v26, %v376_v16 }
  0x91   : > { %v619_v38 = vpop.eup %618 }
  0x92   : > { %v370_v33 = vadd.f32 %v369_v29, %v368_v25  ;;  %v379_v35 = vrot.slane %v378_v31, 1  ;;  %v621_v42 = vpop.eup %620  ;;  %v284_v44 = vmul.f32 0.6931472, %v619_v38 }
  0x93   : > { %v623_v47 = vpop.eup %622  ;;  %v286_v49 = vmul.f32 0.6931472, %v621_v42 }
  0x94   : > { %v371_v39 = vrot.slane %v370_v33, 1  ;;  %v380_v43 = vadd.f32 %v379_v35, %v378_v31  ;;  %v625_v52 = vpop.eup %624  ;;  %v288_v53 = vmul.f32 0.6931472, %v623_v47  ;;  %v303_v55 = vmul.f32 %v299_v37, %v284_v44 }
  0x95   : > { %v290_v56 = vmul.f32 0.6931472, %v625_v52  ;;  %v304_v58 = vmul.f32 %v300_v41, %v286_v49 }
  0x96   : > { %v372_v48 = vadd.f32 %v371_v39, %v370_v33  ;;  %381 = vst [vmem:[%s986_s26 + $0x1] sm:$0x1] %v380_v43  ;;  %v305_v59 = vmul.f32 %v301_v46, %v288_v53  ;;  %v307_v13 = vadd.f32 %v303_v55, %v291_v45 }
  0x97   : > { %v306_v60 = vmul.f32 %v302_v51, %v290_v56  ;;  %v308_v61 = vadd.f32 %v304_v58, %v292_v50 }
  0x98   : > { %373 = vst [vmem:[%s986_s26] sm:$0x1] %v372_v48  ;;  %v309_v62 = vadd.f32 %v305_v59, %v293_v54  ;;  %v311_v63 = vmul.f32 0.5, %v307_v13 }
  0x99   : > { %v310_v0 = vadd.f32 %v306_v60, %v294_v57  ;;  %v312_v14 = vmul.f32 0.5, %v308_v61 }
  0x9a   : > { %v313_v1 = vmul.f32 0.5, %v309_v62  ;;  %v315_v2 = vsub.f32 0.0, %v311_v63 }
  0x9b   : > { %v314_v3 = vmul.f32 0.5, %v310_v0  ;;  %v316_v17 = vsub.f32 0.0, %v312_v14 }
  0x9c   : > { %v317_v4 = vsub.f32 0.0, %v313_v1 }
  0x9d   : > { %v318_v5 = vsub.f32 0.0, %v314_v3  ;;  %v332_v22 = vadd.f32 %v316_v17, %v315_v2 }
  0x9f   : > { %v333_v6 = vadd.f32 %v332_v22, %v317_v4 }
  0xa1   : > { %v334_v7 = vadd.f32 %v333_v6, %v318_v5 }
  0xa3   : > { %v350_v8 = vmul.f32 %v976_v24, %v334_v7 }
  0xa5   : > { %v391_v9 = vrot.slane %v350_v8, 4 }
  0xa7   : > { %v392_v10 = vadd.f32 %v391_v9, %v350_v8 }
  0xa9   : > { %v393_v11 = vrot.slane %v392_v10, 2 }
  0xab   : > { %v394_v12 = vadd.f32 %v393_v11, %v392_v10 }
  0xad   : > { %v395_v15 = vrot.slane %v394_v12, 1 }
  0xaf   : > { %v396_v16 = vadd.f32 %v395_v15, %v394_v12 }
  0xb1   : > { %397 = vst [vmem:[%s986_s26 + $0x3] sm:$0x1] %v396_v16 }
  0xb2   : > { %699 = shalt.err (!%p696_p9)
}
  0xb3   : > { %s700_s18 = scalar_lea.hbm %s1017_s3, 64  ;;  %s704_s6 = scalar_lea.hbm %s1067_s2, 128 }
  0xb4   : > { %p701_p1 = scmp.ne.s32.totalorder %s1017_s3, %s700_s18  ;;  %p705_p5 = scmp.lt.u32.totalorder %s1017_s3, %s1067_s2 }
  0xb5   : > { %p706_p13 = scmp.lt.u32.totalorder %s704_s6, %s700_s18  ;;  %p708_p8 = scmp.lt.u32.totalorder %s700_s18, %s1017_s3 }
  0xb6   : > { %p702_p6 = pnand %p701_p1, %p1079_p0 }
  0xb7   : > { %p707_p3 = por %p706_p13, %p705_p5 }
  0xb8   : > { %p703_p2 = pneg %p702_p6 }
  0xb9   : > { %p709_p11 = por %p708_p8, %p707_p3 }
  0xbb   : > { %p710_p4 = pnand %p709_p11, %p703_p2 }
  0xbd   : > { %713 = shalt.err (!%p710_p4)
}
  0xbe   : > { %539 = dma.vmem_to_hbm [thread:$0]  (%p1079_p0), %s1012_s30, 64, %s1017_s3, %s399_s25  }
  0xbf PF: > { %s424_s19 = sand.u32 1, %s752_s9   ;;  %p1080_p7 = scmp.ne.s32.totalorder %s1073_s24, 0 }
  0xc0   : > { %p1081_p10 = scmp.ge.s32.totalorder %s772_s14, 2  ;;  %s425_s21 = scalar_lea.sflag [#allocation8], %s424_s19 }
  0xc2   : > { %p549_p12 = pnand %p1081_p10, %p1080_p7 }
  0xc4   : > { %747 = dma.done.wait (!%p549_p12), %s425_s21, 64  }
  0xc5   : > { %749 = vsyncadd (!%p549_p12), %s425_s21, 4294967232  ;;  %s21_s14 = sadd.s32 1, %s772_s14   ;;  %s1082_s9 = smov %s756_s10 }
  0xc6   : > { %p18_p9 = scmp.ge.s32.totalorder %s21_s14, 4   ;;  %s1083_s10 = smov %s760_s11 }
  0xc7   : > { %s1084_s11 = smov %s852_s23  ;;  %s1085_s12 = smov %s768_s13 }
  0xc8   : > { %s1086_s13 = smov %s1088_s17  ;;  %20 = sbr.rel (!%p18_p9) target bundleno = 8 (0x8), region = 94 }
  0xcf   :  { %430 = vsyncpa [#allocation7], 1 }
  0xd0   :  { %432 = vsyncpa [#allocation7 + $0x1], 1 }
  0xd1   :  { %433 = vsyncpa [#allocation10], 1 }
  0xd2   :  { %435 = vsyncpa [#allocation10 + $0x1], 1 }
  0xd3   :  { %436 = vsyncpa [#allocation8], 1 }
  0xd4   :  { %438 = vsyncpa [#allocation8 + $0x1], 1 }

</bundles_post_ra>
